<compile_context>
chip_gen: v7x
topology: tpu7x:2x2x1
jax: 0.10.0
libtpu: 0.0.40
codegen_flags: <defaults>
</compile_context>

<pallas_src>
import jax
import jax.numpy as jnp
from jax.experimental import pallas as pl
from jax.experimental.pallas import tpu as pltpu


def _add_const_noise_kernel(gain_ref, x_ref, noise_ref, o_ref):
    # gain_ref: (1, 1) f32 in SMEM; x_ref: (TR, HW); noise_ref: (1, HW); o_ref: (TR, HW)
    g = gain_ref[0, 0]
    scaled_noise = noise_ref[...].astype(jnp.float32) * g          # (1, HW), broadcasts
    o_ref[...] = (x_ref[...].astype(jnp.float32) + scaled_noise).astype(o_ref.dtype)


def _pick_row_tile(rows: int, cols: int, itemsize: int, target_bytes: int) -> int:
    """Largest multiple-of-8 divisor of `rows` whose (tr, cols) tile fits target_bytes.

    Falls back to the full `rows` extent (always a legal block per the (8,128) rule)
    when rows is not a multiple of 8, and to 8 when even the minimal tile exceeds
    the target (rare: only for very large H*W).
    """
    if rows % 8 != 0:
        return rows
    best = 8
    for tr in range(8, rows + 1, 8):
        if rows % tr == 0 and tr * cols * itemsize <= target_bytes:
            best = tr
    return best


def add_const_noise(x: jax.Array, noise: jax.Array, gain: jax.Array,
                    *, target_tile_bytes: int = 2 << 20) -> jax.Array:
    """Computes x + noise * gain  (gain is a scalar, noise broadcasts over N, C)."""
    N, C, H, W = x.shape
    assert noise.shape == (1, 1, H, W)
    rows, cols = N * C, H * W

    # Lane-dense 2D views (contiguous reshapes, no data movement).
    x2 = x.reshape(rows, cols)
    noise2 = noise.reshape(1, cols)
    gain_smem = jnp.reshape(gain.astype(jnp.float32), (1, 1))

    itemsize = jnp.dtype(x.dtype).itemsize
    tr = _pick_row_tile(rows, cols, itemsize, target_tile_bytes)
    grid = (rows // tr,)

    out2 = pl.pallas_call(
        _add_const_noise_kernel,
        out_shape=jax.ShapeDtypeStruct((rows, cols), x.dtype),
        grid_spec=pltpu.PrefetchScalarGridSpec(
            num_scalar_prefetch=0,
            grid=grid,
            in_specs=[
                pl.BlockSpec(memory_space=pltpu.MemorySpace.SMEM),        # gain scalar
                pl.BlockSpec((tr, cols), lambda i: (i, 0)),               # x row tile
                pl.BlockSpec((1, cols), lambda i: (0, 0)),                # noise, resident
            ],
            out_specs=pl.BlockSpec((tr, cols), lambda i: (i, 0)),
        ),
        input_output_aliases={1: 0},   # allow donation of x's HBM buffer
        compiler_params=pltpu.CompilerParams(
            dimension_semantics=("parallel",),
        ),
    )(gain_smem, x2, noise2)

    return out2.reshape(N, C, H, W)


if __name__ == "__main__":
    key = jax.random.PRNGKey(0)
    kx, kn, kg = jax.random.split(key, 3)

    N, C, H, W = 2, 4, 16, 16
    x = jax.random.normal(kx, (N, C, H, W), dtype=jnp.float32)
    # Registered buffer `noise` — deterministic in-script init (StyleGAN2-style (1,1,H,W)).
    noise = jax.random.normal(kn, (1, 1, H, W), dtype=jnp.float32)
    # nn.init.zeros_(gain) in reset_parameters -> scalar zero. Also test a nonzero value
    # so the broadcast path is actually exercised.
    gain_zero = jnp.zeros((1,), dtype=jnp.float32)
    gain_nonzero = jnp.array([0.5], dtype=jnp.float32)

    # References computed up-front (kernel aliases/donates x at the XLA level).
    ref0 = x + noise * gain_zero[0]
    ref1 = x + noise * gain_nonzero[0]

    # Zero-gain case (module default after reset_parameters): output == x.
    out0 = jax.block_until_ready(add_const_noise(x, noise, gain_zero))
    assert jnp.allclose(out0, ref0, atol=1e-6), "mismatch with gain=0"

    # Nonzero-gain case: output == x + noise * gain (broadcast over N, C).
    out1 = jax.block_until_ready(add_const_noise(x, noise, gain_nonzero))
    assert jnp.allclose(out1, ref1, atol=1e-6), "mismatch with gain=0.5"

    print("KERNEL_OK")
</pallas_src>

<mosaic_0001>
module attributes {stable_mosaic.version = 11 : i64} {
  func.func @_add_const_noise_kernel(%arg0: i32, %arg1: memref<1x1xf32, #tpu.memory_space<smem>>, %arg2: memref<8x256xf32, #tpu.memory_space<vmem>>, %arg3: memref<1x256xf32, #tpu.memory_space<vmem>>, %arg4: memref<8x256xf32, #tpu.memory_space<vmem>>) attributes {dimension_semantics = [#tpu.dimension_semantics<parallel>], iteration_bounds = array<i64: 1>, scalar_prefetch = 0 : i64, scratch_operands = 0 : i64, tpu.core_type = #tpu.core_type<tc>, window_params = [{transform_indices = @transform_0, window_bounds = array<i64: 1, 1>}, {transform_indices = @transform_1, window_bounds = array<i64: 8, 256>}, {pipeline_mode = #tpu.pipeline_mode<synchronous>, transform_indices = @transform_2, window_bounds = array<i64: 1, 256>}, {transform_indices = @transform_3, window_bounds = array<i64: 8, 256>}]} {
    %c0 = arith.constant 0 : index
    %c0_0 = arith.constant 0 : index
    %0 = memref.load %arg1[%c0, %c0_0] : memref<1x1xf32, #tpu.memory_space<smem>>
    %c0_1 = arith.constant 0 : index
    %c0_2 = arith.constant 0 : index
    %1 = vector.load %arg3[%c0_1, %c0_2] : memref<1x256xf32, #tpu.memory_space<vmem>>, vector<1x256xf32>
    %2 = vector.broadcast %0 : f32 to vector<1x256xf32>
    %3 = arith.mulf %1, %2 : vector<1x256xf32>
    %c0_3 = arith.constant 0 : index
    %c0_4 = arith.constant 0 : index
    %4 = vector.load %arg2[%c0_3, %c0_4] : memref<8x256xf32, #tpu.memory_space<vmem>>, vector<8x256xf32>
    %5 = vector.broadcast %3 : vector<1x256xf32> to vector<8x256xf32>
    %6 = arith.addf %4, %5 : vector<8x256xf32>
    %c0_5 = arith.constant 0 : index
    %c0_6 = arith.constant 0 : index
    %7 = vector.load %arg4[%c0_5, %c0_6] : memref<8x256xf32, #tpu.memory_space<vmem>>, vector<8x256xf32>
    tpu.vector_store %arg4[%c0_5, %c0_6], %6 {strides = array<i32>} : memref<8x256xf32, #tpu.memory_space<vmem>>, vector<8x256xf32>,
    return
  }
  func.func @transform_0(%arg0: i32) -> (i32, i32) {
    %c0_i32 = arith.constant 0 : i32
    %c0_i32_0 = arith.constant 0 : i32
    %c0_i32_1 = arith.constant 0 : i32
    return %c0_i32, %c0_i32_0 : i32, i32
  }
  func.func @transform_1(%arg0: i32) -> (i32, i32) {
    %c0_i32 = arith.constant 0 : i32
    %c0_i32_0 = arith.constant 0 : i32
    return %arg0, %c0_i32 : i32, i32
  }
  func.func @transform_2(%arg0: i32) -> (i32, i32) {
    %c0_i32 = arith.constant 0 : i32
    %c0_i32_0 = arith.constant 0 : i32
    %c0_i32_1 = arith.constant 0 : i32
    return %c0_i32, %c0_i32_0 : i32, i32
  }
  func.func @transform_3(%arg0: i32) -> (i32, i32) {
    %c0_i32 = arith.constant 0 : i32
    %c0_i32_0 = arith.constant 0 : i32
    return %arg0, %c0_i32 : i32, i32
  }
}

</mosaic_0001>

<bundles_post_ra>
// kernel: tpu_custom_call.1
= control target key start
LH: loop header
LB: loop body
LE: loop exit
PB: predicated region body
PF: predicated region fallthrough
CT: control target
= control target key end

     0   :  { %9 = vsyncpa [#allocation4], 0  ;;  %s166_s0 = inlined_call_operand.<no memory space> [shape: f32[1,1], index: 0, kind: input, shape index: {}]   ;;  %s167_s1 = inlined_call_operand.hbm [shape: f32[8,256], index: 1, kind: input, shape index: {}, may-alias: {1,3}]   ;;  %s168_s2 = inlined_call_operand.vmem [shape: f32[1,256], index: 2, kind: input, shape index: {}]   ;;  %s169_s3 = inlined_call_operand.hbm [shape: f32[8,256], index: 3, kind: output, shape index: {}, may-alias: {1,3}]  }
   0x1   :  { %10 = vsyncpa [#allocation5], 0  ;;  %s114_s12 = smov [#allocation3]   ;;  %s66_s16 = scalar_lea.hbm %s167_s1, 256 }
   0x2   :  { %s19_s13 = sshll.u32 %s114_s12, 4  ;;  %p67_p0 = scmp.ne.s32.totalorder %s167_s1, %s66_s16  ;;  %s20_s13 = int_to_ptr.vmem [resolvable:$true] %s19_s13 }
   0x3   :  { %p70_p1 = scmp.lt.u32.totalorder %s66_s16, %s167_s1 }
   0x5   :  { %p72_p2 = pnand %p70_p1, %p67_p0 }
   0x7   :  { %75 = shalt.err (!%p72_p2)
}
   0x8   :  { %s76_s21 = scalar_lea.vmem %s20_s13, 256  ;;  %p81_p4 = scmp.lt.s32.totalorder %s20_s13, %s20_s13 }
   0x9   :  { %p77_p3 = scmp.ne.s32.totalorder %s20_s13, %s76_s21  ;;  %p82_p5 = scmp.lt.s32.totalorder %s76_s21, %s76_s21 }
   0xb   :  { %p83_p6 = por %p82_p5, %p81_p4 }
   0xd   :  { %p84_p7 = pnand %p83_p6, %p77_p3 }
   0xf   :  { %87 = shalt.err (!%p84_p7)
}
  0x10   :  { %22 = dma.hbm_to_vmem [thread:$0]  %s167_s1, 256, %s20_s13, [#allocation4]  }
  0x11   :  { %110 = dma.done.wait [#allocation4], 256  }
  0x12   :  { %111 = vsyncadd [#allocation4], 4294967040  ;;  %v35_v0 = vlaneseq  ;;  %v30_v2 = vstv %s166_s0  ;;  %v29_v5 = vld [vmem:[%s168_s2] sm:$0x3]  ;;  %v33_v8 = vld [vmem:[#allocation3 + $0x8] sm:$0xff]  ;;  %s115_s28 = smov [#allocation6]  }
  0x13   :  { %v31_v6 = vmul.f32 %v30_v2, %v29_v5  ;;  %v32_v7 = vld [vmem:[#allocation3] sm:$0xff]  ;;  %s55_s29 = sshll.u32 %s115_s28, 4  ;;  %s56_s29 = int_to_ptr.vmem [resolvable:$true] %s55_s29 }
  0x14   :  { %v36_v1 = vshrl.u32 %v35_v0, 7  ;;  %s88_s1 = scalar_lea.vmem %s56_s29, 256  ;;  %p93_p9 = scmp.lt.s32.totalorder %s56_s29, %s56_s29 }
  0x15   :  { %p89_p8 = scmp.ne.s32.totalorder %s56_s29, %s88_s1  ;;  %p94_p10 = scmp.lt.s32.totalorder %s88_s1, %s88_s1 }
  0x16   :  { %v37_v3 = vsub.s32 0, %v36_v1  ;;  %v41_v4 = vsub.s32 1, %v36_v1 }
  0x17   :  { %p95_p11 = por %p94_p10, %p93_p9 }
  0x18   :  { %v38_v9 = vrot.slane %v31_v6, %v37_v3  ;;  %v42_v10 = vrot.slane %v31_v6, %v41_v4 }
  0x19   :  { %p96_p12 = pnand %p95_p11, %p89_p8 }
  0x1a   :  { %v45_v11 = vadd.f32 %v38_v9, %v32_v7  ;;  %v46_v12 = vadd.f32 %v42_v10, %v33_v8 }
  0x1c   :  { %47 = vst [vmem:[#allocation6] sm:$0xff] %v45_v11  ;;  %48 = vst [vmem:[#allocation6 + $0x8] sm:$0xff] %v46_v12 }
  0x1d   :  { %99 = shalt.err (!%p96_p12)
}
  0x1e   :  { %s100_s30 = scalar_lea.hbm %s169_s3, 256 }
  0x1f   :  { %p101_p13 = scmp.ne.s32.totalorder %s169_s3, %s100_s30  ;;  %p104_p0 = scmp.lt.u32.totalorder %s100_s30, %s169_s3 }
  0x21   :  { %p106_p1 = pnand %p104_p0, %p101_p13 }
  0x23   :  { %109 = shalt.err (!%p106_p1)
}
  0x24   :  { %58 = dma.vmem_to_hbm [thread:$0]  %s56_s29, 256, %s169_s3, [#allocation5]  }
  0x25   :  { %112 = dma.done.wait [#allocation5], 256  }
  0x26   :  { %113 = vsyncadd [#allocation5], 4294967040 }
  0x27   :  { %62 = vsyncpa [#allocation4], 1 }
  0x28   :  { %63 = vsyncpa [#allocation5], 1 }

</bundles_post_ra>
